<compile_context>
chip_gen: v6e
topology: v6e:2x2x1
jax: 0.10.0
libtpu: 0.0.40
codegen_flags: <defaults>
</compile_context>

<pallas_src>
import jax
import jax.numpy as jnp
from jax.experimental import pallas as pl
from jax.experimental.pallas import tpu as pltpu


def _bce_kernel(x_ref, t_ref, o_ref, acc_ref):
    i = pl.program_id(1)

    @pl.when(i == 0)
    def _():
        acc_ref[...] = jnp.zeros_like(acc_ref)

    x = x_ref[...].astype(jnp.float32)
    t = t_ref[...].astype(jnp.float32)
    # Numerically stable BCE-with-logits (matches PyTorch):
    #   max(x, 0) - x*t + log1p(exp(-|x|))
    # Pure elementwise update into a tile-shaped accumulator (VPU/EUP only,
    # no per-step cross-lane reduction).
    acc_ref[...] += jnp.maximum(x, 0.0) - x * t + jnp.log1p(jnp.exp(-jnp.abs(x)))

    @pl.when(i == pl.num_programs(1) - 1)
    def _():
        # Single reduction at the end of this split: collapse the tile-shaped
        # accumulator to a lane-aligned (8, 128) partial-sum block.
        tr, ln = acc_ref.shape
        o_ref[...] = jnp.sum(acc_ref[...].reshape(tr // 8, 8, ln), axis=0)[None]


def bce_with_logits_loss(inputs, targets, *, tile_rows=1024):
    assert inputs.shape == targets.shape, "inputs/targets must have the same shape"
    n = int(inputs.size)
    lanes = 128

    x_flat = inputs.reshape(-1)
    t_flat = targets.reshape(-1)

    # Clamp the tile to the (8-row-rounded) data size so tiny inputs use a
    # single small tile; big inputs use the full 1024-row tile.
    rows_needed = (n + lanes - 1) // lanes
    tile_rows = max(8, min(int(tile_rows), ((rows_needed + 7) // 8) * 8))
    chunk = tile_rows * lanes

    # Pad the tail (only if needed) with a large-negative logit / zero target:
    #   loss(pad) = max(-1e4,0) - (-1e4)*0 + log1p(exp(-1e4)) == 0 exactly,
    # so no mask stream is required.
    n_pad = (-n) % chunk
    if n_pad:
        x_flat = jnp.pad(x_flat, (0, n_pad), constant_values=-1e4)
        t_flat = jnp.pad(t_flat, (0, n_pad), constant_values=0)

    total_rows = (n + n_pad) // lanes
    num_tiles = total_rows // tile_rows
    # Split the reduction across 2 TensorCores (v7x megacore) when possible.
    num_splits = 2 if (num_tiles >= 2 and num_tiles % 2 == 0) else 1
    tiles_per_split = num_tiles // num_splits

    x2 = x_flat.reshape(total_rows, lanes)
    t2 = t_flat.reshape(total_rows, lanes)

    in_map = lambda c, i: (c * tiles_per_split + i, 0)

    partials = pl.pallas_call(
        _bce_kernel,
        out_shape=jax.ShapeDtypeStruct((num_splits, 8, lanes), jnp.float32),
        grid_spec=pltpu.PrefetchScalarGridSpec(
            num_scalar_prefetch=0,
            grid=(num_splits, tiles_per_split),
            in_specs=[
                pl.BlockSpec((tile_rows, lanes), in_map),
                pl.BlockSpec((tile_rows, lanes), in_map),
            ],
            out_specs=pl.BlockSpec((1, 8, lanes), lambda c, i: (c, 0, 0)),
            scratch_shapes=[pltpu.VMEM((tile_rows, lanes), jnp.float32)],
        ),
        compiler_params=pltpu.CompilerParams(
            dimension_semantics=("parallel", "arbitrary"),
        ),
    )(x2, t2)

    # Final tiny reduction + mean scaling in the wrapper.
    return jnp.sum(partials) * (1.0 / float(n))


def bce_with_logits_ref(inputs, targets):
    x = inputs.astype(jnp.float32)
    t = targets.astype(jnp.float32)
    loss = jnp.maximum(x, 0.0) - x * t + jnp.log1p(jnp.exp(-jnp.abs(x)))
    return jnp.mean(loss)


if __name__ == "__main__":
    key = jax.random.PRNGKey(0)
    k1, k2 = jax.random.split(key)

    # Small NCHW-like shape: batch=2, channels=4, spatial=16x16.
    shape = (2, 4, 16, 16)
    inputs = jax.random.normal(k1, shape, dtype=jnp.float32) * 2.0
    targets = (jax.random.uniform(k2, shape) > 0.5).astype(jnp.float32)

    out = jax.block_until_ready(bce_with_logits_loss(inputs, targets))
    ref = bce_with_logits_ref(inputs, targets)
    assert jnp.allclose(out, ref, rtol=1e-5, atol=1e-5), (out, ref)

    # Also exercise the non-tile-aligned (padded) path.
    k3, k4 = jax.random.split(k2)
    shape2 = (3, 5, 7, 11)
    inputs2 = jax.random.normal(k3, shape2, dtype=jnp.float32) * 2.0
    targets2 = (jax.random.uniform(k4, shape2) > 0.5).astype(jnp.float32)
    out2 = jax.block_until_ready(bce_with_logits_loss(inputs2, targets2))
    ref2 = bce_with_logits_ref(inputs2, targets2)
    assert jnp.allclose(out2, ref2, rtol=1e-5, atol=1e-5), (out2, ref2)

    print("KERNEL_OK")
</pallas_src>

<mosaic_0001>
module attributes {stable_mosaic.version = 11 : i64} {
  func.func @_bce_kernel(%arg0: i32, %arg1: i32, %arg2: memref<16x128xf32, #tpu.memory_space<vmem>>, %arg3: memref<16x128xf32, #tpu.memory_space<vmem>>, %arg4: memref<1x8x128xf32, #tpu.memory_space<vmem>>, %arg5: memref<16x128xf32, #tpu.memory_space<vmem>>) attributes {dimension_semantics = [#tpu.dimension_semantics<parallel>, #tpu.dimension_semantics<arbitrary>], iteration_bounds = array<i64: 1, 1>, scalar_prefetch = 0 : i64, scratch_operands = 1 : i64, tpu.core_type = #tpu.core_type<tc>, window_params = [{transform_indices = @transform_0, window_bounds = array<i64: 16, 128>}, {transform_indices = @transform_1, window_bounds = array<i64: 16, 128>}, {transform_indices = @transform_2, window_bounds = array<i64: 1, 8, 128>}]} {
    %c0_i32 = arith.constant 0 : i32
    %0 = arith.cmpi eq, %arg1, %c0_i32 : i32
    %1 = arith.extui %0 : i1 to i32
    %c0_i32_0 = arith.constant 0 : i32
    %2 = arith.cmpi ne, %1, %c0_i32_0 : i32
    scf.if %2 {
      %cst_11 = arith.constant 0.000000e+00 : f32
      %21 = vector.broadcast %cst_11 : f32 to vector<16x128xf32>
      %c0_12 = arith.constant 0 : index
      %c0_13 = arith.constant 0 : index
      %22 = vector.load %arg5[%c0_12, %c0_13] : memref<16x128xf32, #tpu.memory_space<vmem>>, vector<16x128xf32>
      tpu.vector_store %arg5[%c0_12, %c0_13], %21 {strides = array<i32>} : memref<16x128xf32, #tpu.memory_space<vmem>>, vector<16x128xf32>,
    } else {
    }
    %c0 = arith.constant 0 : index
    %c0_1 = arith.constant 0 : index
    %3 = vector.load %arg2[%c0, %c0_1] : memref<16x128xf32, #tpu.memory_space<vmem>>, vector<16x128xf32>
    %c0_2 = arith.constant 0 : index
    %c0_3 = arith.constant 0 : index
    %4 = vector.load %arg3[%c0_2, %c0_3] : memref<16x128xf32, #tpu.memory_space<vmem>>, vector<16x128xf32>
    %c0_4 = arith.constant 0 : index
    %c0_5 = arith.constant 0 : index
    %5 = vector.load %arg5[%c0_4, %c0_5] : memref<16x128xf32, #tpu.memory_space<vmem>>, vector<16x128xf32>
    %cst = arith.constant 0.000000e+00 : f32
    %6 = vector.broadcast %cst : f32 to vector<16x128xf32>
    %7 = arith.maximumf %3, %6 : vector<16x128xf32>
    %8 = arith.mulf %3, %4 : vector<16x128xf32>
    %9 = arith.subf %7, %8 : vector<16x128xf32>
    %10 = math.absf %3 : vector<16x128xf32>
    %cst_6 = arith.constant 0.000000e+00 : f32
    %11 = vector.broadcast %cst_6 : f32 to vector<16x128xf32>
    %12 = arith.subf %11, %10 : vector<16x128xf32>
    %13 = math.exp %12 : vector<16x128xf32>
    %14 = math.log1p %13 : vector<16x128xf32>
    %15 = arith.addf %9, %14 : vector<16x128xf32>
    %16 = arith.addf %5, %15 : vector<16x128xf32>
    %c0_7 = arith.constant 0 : index
    %c0_8 = arith.constant 0 : index
    %17 = vector.load %arg5[%c0_7, %c0_8] : memref<16x128xf32, #tpu.memory_space<vmem>>, vector<16x128xf32>
    tpu.vector_store %arg5[%c0_7, %c0_8], %16 {strides = array<i32>} : memref<16x128xf32, #tpu.memory_space<vmem>>, vector<16x128xf32>,
    %c0_i32_9 = arith.constant 0 : i32
    %18 = arith.cmpi eq, %arg1, %c0_i32_9 : i32
    %19 = arith.extui %18 : i1 to i32
    %c0_i32_10 = arith.constant 0 : i32
    %20 = arith.cmpi ne, %19, %c0_i32_10 : i32
    scf.if %20 {
      %c0_11 = arith.constant 0 : index
      %c0_12 = arith.constant 0 : index
      %21 = vector.load %arg5[%c0_11, %c0_12] : memref<16x128xf32, #tpu.memory_space<vmem>>, vector<16x128xf32>
      %22 = vector.shape_cast %21 : vector<16x128xf32> to vector<2x8x128xf32>
      %cst_13 = arith.constant dense<0.000000e+00> : vector<8x128xf32>
      %23 = vector.multi_reduction <add>, %22, %cst_13 [0] : vector<2x8x128xf32> to vector<8x128xf32>
      %24 = vector.shape_cast %23 : vector<8x128xf32> to vector<1x8x128xf32>
      %c0_14 = arith.constant 0 : index
      %c0_15 = arith.constant 0 : index
      %c0_16 = arith.constant 0 : index
      %25 = vector.load %arg4[%c0_14, %c0_15, %c0_16] : memref<1x8x128xf32, #tpu.memory_space<vmem>>, vector<1x8x128xf32>
      tpu.vector_store %arg4[%c0_14, %c0_15, %c0_16], %24 {strides = array<i32>} : memref<1x8x128xf32, #tpu.memory_space<vmem>>, vector<1x8x128xf32>,
    } else {
    }
    return
  }
  func.func @transform_0(%arg0: i32, %arg1: i32) -> (i32, i32) {
    %c1_i32 = arith.constant 1 : i32
    %0 = arith.muli %arg0, %c1_i32 : i32
    %1 = arith.addi %0, %arg1 : i32
    %c0_i32 = arith.constant 0 : i32
    %c0_i32_0 = arith.constant 0 : i32
    return %1, %c0_i32 : i32, i32
  }
  func.func @transform_1(%arg0: i32, %arg1: i32) -> (i32, i32) {
    %c1_i32 = arith.constant 1 : i32
    %0 = arith.muli %arg0, %c1_i32 : i32
    %1 = arith.addi %0, %arg1 : i32
    %c0_i32 = arith.constant 0 : i32
    %c0_i32_0 = arith.constant 0 : i32
    return %1, %c0_i32 : i32, i32
  }
  func.func @transform_2(%arg0: i32, %arg1: i32) -> (i32, i32, i32) {
    %c0_i32 = arith.constant 0 : i32
    %c0_i32_0 = arith.constant 0 : i32
    %c0_i32_1 = arith.constant 0 : i32
    return %arg0, %c0_i32, %c0_i32_0 : i32, i32, i32
  }
}

</mosaic_0001>

<bundles_post_ra>
// kernel: tpu_custom_call.1
= control target key start
LH: loop header
LB: loop body
LE: loop exit
PB: predicated region body
PF: predicated region fallthrough
CT: control target
= control target key end

     0   :  { %7 = vsyncpa [#allocation4], 0  ;;  %s233_s0 = inlined_call_operand.hbm [shape: f32[16,128], index: 0, kind: input, shape index: {}]   ;;  %s234_s1 = inlined_call_operand.hbm [shape: f32[16,128], index: 1, kind: input, shape index: {}]   ;;  %s235_s2 = inlined_call_operand.hbm [shape: f32[1,8,128], index: 2, kind: output, shape index: {}]  }
   0x1   :  { %8 = vsyncpa [#allocation7], 0 }
   0x2   :  { %9 = vsyncpa [#allocation5], 0  ;;  %s204_s9 = smov [#allocation3]  }
   0x3   :  { %s19_s10 = sshll.u32 %s204_s9, 4  ;;  %s20_s10 = int_to_ptr.vmem [resolvable:$true] %s19_s10 }
   0x4   :  { %s146_s11 = scalar_lea.vmem %s20_s10, 256  ;;  %p151_p1 = scmp.lt.s32.totalorder %s20_s10, %s20_s10 }
   0x5   :  { %p147_p0 = scmp.ne.s32.totalorder %s20_s10, %s146_s11  ;;  %p152_p2 = scmp.lt.s32.totalorder %s146_s11, %s146_s11 }
   0x7   :  { %p153_p3 = por %p152_p2, %p151_p1 }
   0x9   :  { %p154_p4 = pnand %p153_p3, %p147_p0 }
   0xb   :  { %157 = shalt.err (!%p154_p4)
}
   0xc   :  { %s205_s12 = smov 128   ;;  %s206_s13 = smov 8  }
   0xd   :  { %25 = dma.hbm_to_vmem [thread:$0]  %s233_s0, 256, %s20_s10, [#allocation4], %s205_s12, %s205_s12, %s206_s13  }
   0xe   :  { %s207_s16 = smov [#allocation6]  }
   0xf   :  { %s35_s17 = sshll.u32 %s207_s16, 4  ;;  %s36_s17 = int_to_ptr.vmem [resolvable:$true] %s35_s17 }
  0x10   :  { %s166_s18 = scalar_lea.vmem %s36_s17, 256  ;;  %p171_p6 = scmp.lt.s32.totalorder %s36_s17, %s36_s17 }
  0x11   :  { %p167_p5 = scmp.ne.s32.totalorder %s36_s17, %s166_s18  ;;  %p172_p7 = scmp.lt.s32.totalorder %s166_s18, %s166_s18 }
  0x13   :  { %p173_p8 = por %p172_p7, %p171_p6 }
  0x15   :  { %p174_p9 = pnand %p173_p8, %p167_p5 }
  0x17   :  { %177 = shalt.err (!%p174_p9)
}
  0x18   :  { %41 = dma.hbm_to_vmem [thread:$0]  %s234_s1, 256, %s36_s17, [#allocation7], %s205_s12, %s205_s12, %s206_s13  }
  0x19   :  { %198 = dma.done.wait [#allocation4], 256  }
  0x1a   :  { %199 = vsyncadd [#allocation4], 4294967040 }
  0x1b   :  { %200 = dma.done.wait [#allocation7], 256  }
  0x1c   :  { %201 = vsyncadd [#allocation7], 4294967040  ;;  %v58_v0 = vld [vmem:[#allocation3] sm:$0xff]  ;;  %v59_v1 = vld [vmem:[#allocation3 + $0x8] sm:$0xff]  ;;  %s208_s0 = smov [#allocation8]  }
  0x1d   :  { %v70_v2 = vand.u32 2147483647, %v58_v0  ;;  %v71_v3 = vand.u32 2147483647, %v59_v1  ;;  %v60_v14 = vld [vmem:[#allocation6] sm:$0xff]  ;;  %v61_v15 = vld [vmem:[#allocation6 + $0x8] sm:$0xff] }
  0x1e   :  { %v64_v17 = vmax.f32 %v58_v0, 0.0  ;;  %v66_v18 = vmul.f32 %v60_v14, %v58_v0  ;;  %v65_v21 = vmax.f32 %v59_v1, 0.0  ;;  %v67_v22 = vmul.f32 %v61_v15, %v59_v1  ;;  %s115_s1 = sshll.u32 %s208_s0, 4  ;;  %s116_s1 = int_to_ptr.vmem [resolvable:$true] %s115_s1 }
  0x1f   :  { %v72_v4 = vsub.f32 0.0, %v70_v2  ;;  %v73_v5 = vsub.f32 0.0, %v71_v3  ;;  %s178_s21 = scalar_lea.vmem %s116_s1, 128  ;;  %p183_p11 = scmp.lt.s32.totalorder %s116_s1, %s116_s1 }
  0x20   :  { %v68_v26 = vsub.f32 %v64_v17, %v66_v18  ;;  %v69_v29 = vsub.f32 %v65_v21, %v67_v22  ;;  %p179_p10 = scmp.ne.s32.totalorder %s116_s1, %s178_s21  ;;  %p184_p12 = scmp.lt.s32.totalorder %s178_s21, %s178_s21 }
  0x21   :  { %v74_v6 = vmul.f32 1.442695, %v72_v4  ;;  %v76_v7 = vmul.f32 1.442695, %v73_v5 }
  0x22   :  { %p185_p13 = por %p184_p12, %p183_p11 }
  0x23   :  { %130 = vpow2.f32 %v74_v6 }
  0x24   :  { %132 = vpow2.f32 %v76_v7  ;;  %p186_p0 = pnand %p185_p13, %p179_p10 }
  0x30   :  { %v131_v8 = vpop.eup %130 }
  0x31   :  { %v133_v9 = vpop.eup %132  ;;  %v78_v10 = vadd.f32 1.0, %v131_v8  ;;  %v81_v12 = vmul.f32 -0.5, %v131_v8  ;;  %v84_v19 = vand.u32 2147483647, %v131_v8 }
  0x32   :  { %v87_v11 = vadd.f32 1.0, %v133_v9  ;;  %v90_v13 = vmul.f32 -0.5, %v133_v9  ;;  %v93_v23 = vand.u32 2147483647, %v133_v9 }
  0x33   :  { %134 = vlog2.f32 %v78_v10  ;;  %v82_v16 = vadd.f32 1.0, %v81_v12  ;;  %vm85_vm0 = vcmp.lt.f32.partialorder %v84_v19, 0.0004427343 }
  0x34   :  { %136 = vlog2.f32 %v87_v11  ;;  %v91_v20 = vadd.f32 1.0, %v90_v13  ;;  %vm94_vm1 = vcmp.lt.f32.partialorder %v93_v23, 0.0004427343 }
  0x35   :  { %v83_v24 = vmul.f32 %v131_v8, %v82_v16 }
  0x36   :  { %v92_v27 = vmul.f32 %v133_v9, %v91_v20 }
  0x40   :  { %v135_v25 = vpop.eup %134 }
  0x41   :  { %v137_v28 = vpop.eup %136  ;;  %v80_v30 = vmul.f32 0.6931472, %v135_v25 }
  0x42   :  { %v89_v31 = vmul.f32 0.6931472, %v137_v28 }
  0x43   :  { %v86_v32 = vsel %vm85_vm0, %v83_v24, %v80_v30 }
  0x44   :  { %v95_v33 = vsel %vm94_vm1, %v92_v27, %v89_v31  ;;  %v96_v34 = vadd.f32 %v86_v32, %v68_v26 }
  0x45   :  { %v97_v35 = vadd.f32 %v95_v33, %v69_v29 }
  0x47   :  { %v107_v36 = vadd.f32 %v97_v35, %v96_v34 }
  0x49   :  { %108 = vst [vmem:[#allocation8] sm:$0xff] %v107_v36 }
  0x4a   :  { %189 = shalt.err (!%p186_p0)
}
  0x4b   :  { %118 = dma.vmem_to_hbm [thread:$0]  %s116_s1, 128, %s235_s2, [#allocation5]  }
  0x4c   :  { %202 = dma.done.wait [#allocation5], 128  }
  0x4d   :  { %203 = vsyncadd [#allocation5], 4294967168 }
  0x4e   :  { %122 = vsyncpa [#allocation4], 1 }
  0x4f   :  { %123 = vsyncpa [#allocation7], 1 }
  0x50   :  { %124 = vsyncpa [#allocation5], 1 }

</bundles_post_ra>
